<compile_context>
chip_gen: v7x
topology: tpu7x:2x2x1
jax: 0.10.0
libtpu: 0.0.40
codegen_flags: <defaults>
</compile_context>

<pallas_src>
import math
from functools import partial

import jax
import jax.numpy as jnp
from jax.experimental import pallas as pl
from jax.experimental.pallas import tpu as pltpu

LANE = 128


# ---------------------------------------------------------------------------
# Kernel: grid = (batch tiles, K tiles over in_dim).
# Backbone matmul accumulates over k; adapter + classifier run on the last k step.
# Arg order: scalar-prefetch ref first, then inputs, then output, then scratch.
# ---------------------------------------------------------------------------
def ease_kernel(task_ref,               # SMEM (1,) int32  -- consumed by index_maps
                x_ref,                  # (TM, TK)     bf16
                w1_ref, b1_ref,         # (TK, Hp) bf16, (1, Hp) f32
                wd_ref, bd_ref,         # (Hp, Rp) bf16, (1, Rp) f32
                wu_ref, bu_ref,         # (Rp, Hp) bf16, (1, Hp) f32
                wc_ref, bc_ref,         # (Hp, Cp) bf16, (1, Cp) f32
                out_ref,                # (TM, Cp) f32
                acc_ref):               # (TM, Hp) f32 scratch (backbone accumulator)
    del task_ref  # only used by the BlockSpec index_maps
    k = pl.program_id(1)

    @pl.when(k == 0)
    def _():
        acc_ref[...] = jnp.zeros_like(acc_ref)

    # backbone partial sum: acc += x[:, k-tile] @ W1[k-tile, :]   (bf16 -> f32 MXU)
    acc_ref[...] += jnp.dot(x_ref[...], w1_ref[...],
                            preferred_element_type=jnp.float32)

    @pl.when(k == pl.num_programs(1) - 1)
    def _():
        feats = jnp.maximum(acc_ref[...] + b1_ref[...], 0.0)

        # adapter: adapted = feats + (ReLU(feats @ Wd + bd) @ Wu + bu)
        down = jnp.dot(feats.astype(jnp.bfloat16), wd_ref[...],
                       preferred_element_type=jnp.float32) + bd_ref[...]
        down = jnp.maximum(down, 0.0)
        up = jnp.dot(down.astype(jnp.bfloat16), wu_ref[...],
                     preferred_element_type=jnp.float32) + bu_ref[...]
        adapted = feats + up

        # classifier: logits = adapted @ Wc + bc   (lane-dense Cp output -> unmasked vst)
        out_ref[...] = jnp.dot(adapted.astype(jnp.bfloat16), wc_ref[...],
                               preferred_element_type=jnp.float32) + bc_ref[...]


# ---------------------------------------------------------------------------
# Parameter packing: pad feature dims to 128 lanes, pad in_dim for K-tiling,
# stack per-task weights, cast matmul operands to bf16 (biases stay f32).
# ---------------------------------------------------------------------------
def _round_up(n, m):
    return ((n + m - 1) // m) * m


def _pad_axis(a, target, axis):
    pad = target - a.shape[axis]
    if pad <= 0:
        return a
    widths = [(0, 0)] * a.ndim
    widths[axis] = (0, pad)
    return jnp.pad(a, widths)


def _pad_k_dim(in_dim):
    # Lane-dense K; once K-tiled (in_dim > 512) make it a multiple of the 512-wide K tile.
    return _round_up(in_dim, LANE) if in_dim <= 512 else _round_up(in_dim, 512)


def pack_params(params):
    in_dim = params["backbone_w1"].shape[0]
    hidden = params["backbone_w1"].shape[1]
    red = params["adapter_down_w"][0].shape[1]
    ncls = params["classifier_w"][0].shape[1]
    Kp = _pad_k_dim(in_dim)
    Hp, Rp, Cp = _round_up(hidden, LANE), _round_up(red, LANE), _round_up(ncls, LANE)

    def stack(lst, pads, cast_bf16):
        out = []
        for a in lst:
            for ax, tgt in pads:
                a = _pad_axis(a, tgt, ax)
            out.append(a)
        s = jnp.stack(out, axis=0)
        return s.astype(jnp.bfloat16) if cast_bf16 else s.astype(jnp.float32)

    w1 = _pad_axis(_pad_axis(params["backbone_w1"], Hp, 1), Kp, 0)
    return {
        "w1": w1.astype(jnp.bfloat16),
        "b1": _pad_axis(params["backbone_b1"], Hp, 1).astype(jnp.float32),
        "wd": stack(params["adapter_down_w"], [(0, Hp), (1, Rp)], True),
        "bd": stack(params["adapter_down_b"], [(1, Rp)], False),
        "wu": stack(params["adapter_up_w"], [(0, Rp), (1, Hp)], True),
        "bu": stack(params["adapter_up_b"], [(1, Hp)], False),
        "wc": stack(params["classifier_w"], [(0, Hp), (1, Cp)], True),
        "bc": stack(params["classifier_b"], [(1, Cp)], False),
    }


def _vmem_limit_bytes():
    # ~100 MiB on 128-MiB parts (v5e/v6e), ~56 MiB on 64-MiB parts (v7x); safe fallback.
    cap = 64 * 1024 * 1024
    try:
        cap = int(getattr(pltpu.get_tpu_info(), "vmem_capacity_bytes", cap))
    except Exception:
        pass
    return int(max(min(cap - 8 * 1024 * 1024, 100 * 1024 * 1024), 32 * 1024 * 1024))


# ---------------------------------------------------------------------------
# Forward wrapper (jitted). task_idx is a *dynamic* device scalar.
# ---------------------------------------------------------------------------
@partial(jax.jit, static_argnames=("num_classes",))
def ease_forward(x_nchw, packed, task_idx, *, num_classes):
    B = x_nchw.shape[0]
    x = x_nchw.reshape(B, -1).astype(jnp.bfloat16)     # NCHW -> [B, C*H*W], bf16
    Kp, Hp = packed["w1"].shape
    Rp = packed["wd"].shape[2]
    Cp = packed["wc"].shape[2]

    # Pad flattened input columns to match the padded W1 rows (zeros contribute nothing).
    if x.shape[1] != Kp:
        x = jnp.pad(x, ((0, 0), (0, Kp - x.shape[1])))

    # Batch tiling: 16-row aligned (bf16 sublane packing), tiles up to 512 rows, and
    # >= 2 grid steps whenever B allows it so the "parallel" axis can use both v7x TCs.
    B16 = _round_up(B, 16)
    if B16 <= 16:
        TM = B16
    else:
        TM = min(512, _round_up((B16 + 1) // 2, 16))
    B_pad = _round_up(B16, TM)
    if B_pad != B:
        x = jnp.pad(x, ((0, B_pad - B), (0, 0)))

    # K tiling of the backbone matmul (bounded VMEM for realistic conv-flatten widths).
    TK = min(Kp, 512)
    grid = (B_pad // TM, Kp // TK)

    task = jnp.asarray(task_idx, jnp.int32).reshape((1,))

    # Grid-constant blocks: single VMEM buffer (no wasted double buffer).
    single = dict(pipeline_mode=pl.Buffered(1))

    flops = 2 * B_pad * (Kp * Hp + Hp * Rp + Rp * Hp + Hp * Cp)
    bytes_accessed = (B_pad * Kp * 2 + B_pad * Cp * 4
                      + (Kp * Hp + Hp * Rp + Rp * Hp + Hp * Cp) * 2
                      + (2 * Hp + Rp + Cp) * 4)

    out = pl.pallas_call(
        ease_kernel,
        out_shape=jax.ShapeDtypeStruct((B_pad, Cp), jnp.float32),
        grid_spec=pltpu.PrefetchScalarGridSpec(
            num_scalar_prefetch=1,
            grid=grid,
            in_specs=[
                pl.BlockSpec((TM, TK), lambda i, k, t: (i, k)),                        # x
                pl.BlockSpec((TK, Hp), lambda i, k, t: (k, 0)),                        # W1
                pl.BlockSpec((1, Hp),  lambda i, k, t: (0, 0), **single),              # b1
                pl.BlockSpec((None, Hp, Rp), lambda i, k, t: (t[0], 0, 0), **single),  # Wd[task]
                pl.BlockSpec((None, 1, Rp),  lambda i, k, t: (t[0], 0, 0), **single),  # bd[task]
                pl.BlockSpec((None, Rp, Hp), lambda i, k, t: (t[0], 0, 0), **single),  # Wu[task]
                pl.BlockSpec((None, 1, Hp),  lambda i, k, t: (t[0], 0, 0), **single),  # bu[task]
                pl.BlockSpec((None, Hp, Cp), lambda i, k, t: (t[0], 0, 0), **single),  # Wc[task]
                pl.BlockSpec((None, 1, Cp),  lambda i, k, t: (t[0], 0, 0), **single),  # bc[task]
            ],
            out_specs=pl.BlockSpec((TM, Cp), lambda i, k, t: (i, 0)),
            scratch_shapes=[pltpu.VMEM((TM, Hp), jnp.float32)],
        ),
        compiler_params=pltpu.CompilerParams(
            dimension_semantics=("parallel", "arbitrary"),
            vmem_limit_bytes=_vmem_limit_bytes()),
        cost_estimate=pl.CostEstimate(
            flops=flops, transcendentals=0, bytes_accessed=bytes_accessed),
    )(task, x, packed["w1"], packed["b1"], packed["wd"], packed["bd"],
      packed["wu"], packed["bu"], packed["wc"], packed["bc"])

    return out[:B, :num_classes]


# ---------------------------------------------------------------------------
# Init (mimics PyTorch nn.Linear uniform init) and pure-JAX references.
# ---------------------------------------------------------------------------
def init_params(key, in_dim, hidden_dim, reduction_dim, num_classes, num_tasks):
    def linear(k, fan_in, fan_out):
        k_w, k_b = jax.random.split(k)
        bound = 1.0 / math.sqrt(fan_in)
        w = jax.random.uniform(k_w, (fan_in, fan_out), jnp.float32, -bound, bound)
        b = jax.random.uniform(k_b, (1, fan_out), jnp.float32, -bound, bound)
        return w, b

    keys = jax.random.split(key, 1 + 3 * num_tasks)
    w1, b1 = linear(keys[0], in_dim, hidden_dim)

    adw, adb, auw, aub, cw, cb = [], [], [], [], [], []
    for t in range(num_tasks):
        kd, ku, kc = keys[1 + 3 * t], keys[2 + 3 * t], keys[3 + 3 * t]
        dw, db = linear(kd, hidden_dim, reduction_dim)
        uw, ub = linear(ku, reduction_dim, hidden_dim)
        w_c, b_c = linear(kc, hidden_dim, num_classes)
        adw.append(dw); adb.append(db)
        auw.append(uw); aub.append(ub)
        cw.append(w_c); cb.append(b_c)

    return {
        "backbone_w1": w1, "backbone_b1": b1,
        "adapter_down_w": adw, "adapter_down_b": adb,
        "adapter_up_w": auw, "adapter_up_b": aub,
        "classifier_w": cw, "classifier_b": cb,
    }


def ease_reference(x_nchw, params, task_idx, mirror_bf16):
    """Pure-JAX reference. If mirror_bf16, round matmul operands to bf16 like the kernel."""
    def q(a):
        return a.astype(jnp.bfloat16).astype(jnp.float32) if mirror_bf16 else a

    B = x_nchw.shape[0]
    x = q(x_nchw.reshape(B, -1))
    feats = jnp.maximum(x @ q(params["backbone_w1"]) + params["backbone_b1"], 0.0)
    down = jnp.maximum(q(feats) @ q(params["adapter_down_w"][task_idx])
                       + params["adapter_down_b"][task_idx], 0.0)
    up = q(down) @ q(params["adapter_up_w"][task_idx]) + params["adapter_up_b"][task_idx]
    adapted = feats + up
    return q(adapted) @ q(params["classifier_w"][task_idx]) + params["classifier_b"][task_idx]


if __name__ == "__main__":
    # Small shapes consistent with the module.
    B, C, H, W = 2, 4, 16, 16
    hidden_dim = 32          # backbone.fc1.out_features (feature dim)
    reduction_dim = 16       # Adapter bottleneck
    num_classes = 10
    num_tasks = 2            # two calls to add_task()
    task_idx = 1

    key = jax.random.PRNGKey(0)
    k_x, k_p = jax.random.split(key)
    x = jax.random.normal(k_x, (B, C, H, W), jnp.float32)
    params = init_params(k_p, C * H * W, hidden_dim, reduction_dim,
                         num_classes, num_tasks)
    packed = pack_params(params)

    logits = ease_forward(x, packed, jnp.int32(task_idx), num_classes=num_classes)
    logits = jax.block_until_ready(logits)

    ref_bf16 = ease_reference(x, params, task_idx, mirror_bf16=True)
    ref_f32 = ease_reference(x, params, task_idx, mirror_bf16=False)

    assert logits.shape == (B, num_classes)
    assert jnp.allclose(logits, ref_bf16, atol=5e-3, rtol=5e-3), "mismatch vs bf16-mirrored reference"
    assert jnp.allclose(logits, ref_f32, atol=5e-2, rtol=5e-2), "mismatch vs f32 reference"

    print("KERNEL_OK")
</pallas_src>

<mosaic_0001>
module attributes {stable_mosaic.version = 11 : i64} {
  func.func @ease_kernel(%arg0: i32, %arg1: i32, %arg2: memref<1xi32, #tpu.memory_space<smem>>, %arg3: memref<16x512xbf16, #tpu.memory_space<vmem>>, %arg4: memref<512x128xbf16, #tpu.memory_space<vmem>>, %arg5: memref<1x128xf32, #tpu.memory_space<vmem>>, %arg6: memref<1x128x128xbf16, #tpu.memory_space<vmem>>, %arg7: memref<1x1x128xf32, #tpu.memory_space<vmem>>, %arg8: memref<1x128x128xbf16, #tpu.memory_space<vmem>>, %arg9: memref<1x1x128xf32, #tpu.memory_space<vmem>>, %arg10: memref<1x128x128xbf16, #tpu.memory_space<vmem>>, %arg11: memref<1x1x128xf32, #tpu.memory_space<vmem>>, %arg12: memref<16x128xf32, #tpu.memory_space<vmem>>, %arg13: memref<16x128xf32, #tpu.memory_space<vmem>>) attributes {dimension_semantics = [#tpu.dimension_semantics<parallel>, #tpu.dimension_semantics<arbitrary>], iteration_bounds = array<i64: 1, 2>, scalar_prefetch = 1 : i64, scratch_operands = 1 : i64, tpu.core_type = #tpu.core_type<tc>, window_params = [{transform_indices = @transform_0, window_bounds = array<i64: 16, 512>}, {transform_indices = @transform_1, window_bounds = array<i64: 512, 128>}, {pipeline_mode = #tpu.pipeline_mode<synchronous>, transform_indices = @transform_2, window_bounds = array<i64: 1, 128>}, {pipeline_mode = #tpu.pipeline_mode<synchronous>, transform_indices = @transform_3, window_bounds = array<i64: 1, 128, 128>}, {pipeline_mode = #tpu.pipeline_mode<synchronous>, transform_indices = @transform_4, window_bounds = array<i64: 1, 1, 128>}, {pipeline_mode = #tpu.pipeline_mode<synchronous>, transform_indices = @transform_5, window_bounds = array<i64: 1, 128, 128>}, {pipeline_mode = #tpu.pipeline_mode<synchronous>, transform_indices = @transform_6, window_bounds = array<i64: 1, 1, 128>}, {pipeline_mode = #tpu.pipeline_mode<synchronous>, transform_indices = @transform_7, window_bounds = array<i64: 1, 128, 128>}, {pipeline_mode = #tpu.pipeline_mode<synchronous>, transform_indices = @transform_8, window_bounds = array<i64: 1, 1, 128>}, {transform_indices = @transform_9, window_bounds = array<i64: 16, 128>}]} {
    %c0_i32 = arith.constant 0 : i32
    %0 = arith.cmpi eq, %arg1, %c0_i32 : i32
    %1 = arith.extui %0 : i1 to i32
    %c0_i32_0 = arith.constant 0 : i32
    %2 = arith.cmpi ne, %1, %c0_i32_0 : i32
    scf.if %2 {
      %cst_9 = arith.constant 0.000000e+00 : f32
      %12 = vector.broadcast %cst_9 : f32 to vector<16x128xf32>
      %c0_10 = arith.constant 0 : index
      %c0_11 = arith.constant 0 : index
      %13 = vector.load %arg13[%c0_10, %c0_11] : memref<16x128xf32, #tpu.memory_space<vmem>>, vector<16x128xf32>
      tpu.vector_store %arg13[%c0_10, %c0_11], %12 {strides = array<i32>} : memref<16x128xf32, #tpu.memory_space<vmem>>, vector<16x128xf32>,
    } else {
    }
    %c0 = arith.constant 0 : index
    %c0_1 = arith.constant 0 : index
    %3 = vector.load %arg13[%c0, %c0_1] : memref<16x128xf32, #tpu.memory_space<vmem>>, vector<16x128xf32>
    %c0_2 = arith.constant 0 : index
    %c0_3 = arith.constant 0 : index
    %4 = vector.load %arg3[%c0_2, %c0_3] : memref<16x512xbf16, #tpu.memory_space<vmem>>, vector<16x512xbf16>
    %c0_4 = arith.constant 0 : index
    %c0_5 = arith.constant 0 : index
    %5 = vector.load %arg4[%c0_4, %c0_5] : memref<512x128xbf16, #tpu.memory_space<vmem>>, vector<512x128xbf16>
    %cst = arith.constant dense<0.000000e+00> : vector<16x128xf32>
    %6 = tpu.matmul %4, %5, %cst {dimension_numbers = #tpu.dot_dimension_numbers<[1], [0], [0], [1], [0, 0, 1, 1], [], []>} : vector<16x512xbf16>, vector<512x128xbf16>, vector<16x128xf32> -> vector<16x128xf32>
    %7 = arith.addf %3, %6 : vector<16x128xf32>
    %c0_6 = arith.constant 0 : index
    %c0_7 = arith.constant 0 : index
    %8 = vector.load %arg13[%c0_6, %c0_7] : memref<16x128xf32, #tpu.memory_space<vmem>>, vector<16x128xf32>
    tpu.vector_store %arg13[%c0_6, %c0_7], %7 {strides = array<i32>} : memref<16x128xf32, #tpu.memory_space<vmem>>, vector<16x128xf32>,
    %c1_i32 = arith.constant 1 : i32
    %9 = arith.cmpi eq, %arg1, %c1_i32 : i32
    %10 = arith.extui %9 : i1 to i32
    %c0_i32_8 = arith.constant 0 : i32
    %11 = arith.cmpi ne, %10, %c0_i32_8 : i32
    scf.if %11 {
      %c0_9 = arith.constant 0 : index
      %c0_10 = arith.constant 0 : index
      %12 = vector.load %arg13[%c0_9, %c0_10] : memref<16x128xf32, #tpu.memory_space<vmem>>, vector<16x128xf32>
      %c0_11 = arith.constant 0 : index
      %c0_12 = arith.constant 0 : index
      %13 = vector.load %arg5[%c0_11, %c0_12] : memref<1x128xf32, #tpu.memory_space<vmem>>, vector<1x128xf32>
      %14 = vector.broadcast %13 : vector<1x128xf32> to vector<16x128xf32>
      %15 = arith.addf %12, %14 : vector<16x128xf32>
      %cst_13 = arith.constant 0.000000e+00 : f32
      %16 = vector.broadcast %cst_13 : f32 to vector<16x128xf32>
      %17 = arith.maximumf %15, %16 : vector<16x128xf32>
      %18 = arith.truncf %17 : vector<16x128xf32> to vector<16x128xbf16>
      %c0_14 = arith.constant 0 : index
      %c0_15 = arith.constant 0 : index
      %c0_16 = arith.constant 0 : index
      %19 = vector.load %arg6[%c0_14, %c0_15, %c0_16] : memref<1x128x128xbf16, #tpu.memory_space<vmem>>, vector<1x128x128xbf16>
      %20 = vector.shape_cast %19 : vector<1x128x128xbf16> to vector<128x128xbf16>
      %cst_17 = arith.constant dense<0.000000e+00> : vector<16x128xf32>
      %21 = tpu.matmul %18, %20, %cst_17 {dimension_numbers = #tpu.dot_dimension_numbers<[1], [0], [0], [1], [0, 0, 1, 1], [], []>} : vector<16x128xbf16>, vector<128x128xbf16>, vector<16x128xf32> -> vector<16x128xf32>
      %c0_18 = arith.constant 0 : index
      %c0_19 = arith.constant 0 : index
      %c0_20 = arith.constant 0 : index
      %22 = vector.load %arg7[%c0_18, %c0_19, %c0_20] : memref<1x1x128xf32, #tpu.memory_space<vmem>>, vector<1x1x128xf32>
      %23 = vector.shape_cast %22 : vector<1x1x128xf32> to vector<1x128xf32>
      %24 = vector.broadcast %23 : vector<1x128xf32> to vector<16x128xf32>
      %25 = arith.addf %21, %24 : vector<16x128xf32>
      %cst_21 = arith.constant 0.000000e+00 : f32
      %26 = vector.broadcast %cst_21 : f32 to vector<16x128xf32>
      %27 = arith.maximumf %25, %26 : vector<16x128xf32>
      %28 = arith.truncf %27 : vector<16x128xf32> to vector<16x128xbf16>
      %c0_22 = arith.constant 0 : index
      %c0_23 = arith.constant 0 : index
      %c0_24 = arith.constant 0 : index
      %29 = vector.load %arg8[%c0_22, %c0_23, %c0_24] : memref<1x128x128xbf16, #tpu.memory_space<vmem>>, vector<1x128x128xbf16>
      %30 = vector.shape_cast %29 : vector<1x128x128xbf16> to vector<128x128xbf16>
      %cst_25 = arith.constant dense<0.000000e+00> : vector<16x128xf32>
      %31 = tpu.matmul %28, %30, %cst_25 {dimension_numbers = #tpu.dot_dimension_numbers<[1], [0], [0], [1], [0, 0, 1, 1], [], []>} : vector<16x128xbf16>, vector<128x128xbf16>, vector<16x128xf32> -> vector<16x128xf32>
      %c0_26 = arith.constant 0 : index
      %c0_27 = arith.constant 0 : index
      %c0_28 = arith.constant 0 : index
      %32 = vector.load %arg9[%c0_26, %c0_27, %c0_28] : memref<1x1x128xf32, #tpu.memory_space<vmem>>, vector<1x1x128xf32>
      %33 = vector.shape_cast %32 : vector<1x1x128xf32> to vector<1x128xf32>
      %34 = vector.broadcast %33 : vector<1x128xf32> to vector<16x128xf32>
      %35 = arith.addf %31, %34 : vector<16x128xf32>
      %36 = arith.addf %17, %35 : vector<16x128xf32>
      %37 = arith.truncf %36 : vector<16x128xf32> to vector<16x128xbf16>
      %c0_29 = arith.constant 0 : index
      %c0_30 = arith.constant 0 : index
      %c0_31 = arith.constant 0 : index
      %38 = vector.load %arg10[%c0_29, %c0_30, %c0_31] : memref<1x128x128xbf16, #tpu.memory_space<vmem>>, vector<1x128x128xbf16>
      %39 = vector.shape_cast %38 : vector<1x128x128xbf16> to vector<128x128xbf16>
      %cst_32 = arith.constant dense<0.000000e+00> : vector<16x128xf32>
      %40 = tpu.matmul %37, %39, %cst_32 {dimension_numbers = #tpu.dot_dimension_numbers<[1], [0], [0], [1], [0, 0, 1, 1], [], []>} : vector<16x128xbf16>, vector<128x128xbf16>, vector<16x128xf32> -> vector<16x128xf32>
      %c0_33 = arith.constant 0 : index
      %c0_34 = arith.constant 0 : index
      %c0_35 = arith.constant 0 : index
      %41 = vector.load %arg11[%c0_33, %c0_34, %c0_35] : memref<1x1x128xf32, #tpu.memory_space<vmem>>, vector<1x1x128xf32>
      %42 = vector.shape_cast %41 : vector<1x1x128xf32> to vector<1x128xf32>
      %43 = vector.broadcast %42 : vector<1x128xf32> to vector<16x128xf32>
      %44 = arith.addf %40, %43 : vector<16x128xf32>
      %c0_36 = arith.constant 0 : index
      %c0_37 = arith.constant 0 : index
      %45 = vector.load %arg12[%c0_36, %c0_37] : memref<16x128xf32, #tpu.memory_space<vmem>>, vector<16x128xf32>
      tpu.vector_store %arg12[%c0_36, %c0_37], %44 {strides = array<i32>} : memref<16x128xf32, #tpu.memory_space<vmem>>, vector<16x128xf32>,
    } else {
    }
    return
  }
  func.func @transform_0(%arg0: i32, %arg1: i32, %arg2: memref<1xi32, #tpu.memory_space<smem>>) -> (i32, i32) {
    %c0_i32 = arith.constant 0 : i32
    return %arg0, %arg1 : i32, i32
  }
  func.func @transform_1(%arg0: i32, %arg1: i32, %arg2: memref<1xi32, #tpu.memory_space<smem>>) -> (i32, i32) {
    %c0_i32 = arith.constant 0 : i32
    %c0_i32_0 = arith.constant 0 : i32
    return %arg1, %c0_i32 : i32, i32
  }
  func.func @transform_2(%arg0: i32, %arg1: i32, %arg2: memref<1xi32, #tpu.memory_space<smem>>) -> (i32, i32) {
    %c0_i32 = arith.constant 0 : i32
    %c0_i32_0 = arith.constant 0 : i32
    %c0_i32_1 = arith.constant 0 : i32
    return %c0_i32, %c0_i32_0 : i32, i32
  }
  func.func @transform_3(%arg0: i32, %arg1: i32, %arg2: memref<1xi32, #tpu.memory_space<smem>>) -> (i32, i32, i32) {
    %c0 = arith.constant 0 : index
    %0 = memref.load %arg2[%c0] : memref<1xi32, #tpu.memory_space<smem>>
    %c0_i32 = arith.constant 0 : i32
    %c0_i32_0 = arith.constant 0 : i32
    %c0_i32_1 = arith.constant 0 : i32
    return %0, %c0_i32, %c0_i32_0 : i32, i32, i32
  }
  func.func @transform_4(%arg0: i32, %arg1: i32, %arg2: memref<1xi32, #tpu.memory_space<smem>>) -> (i32, i32, i32) {
    %c0 = arith.constant 0 : index
    %0 = memref.load %arg2[%c0] : memref<1xi32, #tpu.memory_space<smem>>
    %c0_i32 = arith.constant 0 : i32
    %c0_i32_0 = arith.constant 0 : i32
    %c0_i32_1 = arith.constant 0 : i32
    return %0, %c0_i32, %c0_i32_0 : i32, i32, i32
  }
  func.func @transform_5(%arg0: i32, %arg1: i32, %arg2: memref<1xi32, #tpu.memory_space<smem>>) -> (i32, i32, i32) {
    %c0 = arith.constant 0 : index
    %0 = memref.load %arg2[%c0] : memref<1xi32, #tpu.memory_space<smem>>
    %c0_i32 = arith.constant 0 : i32
    %c0_i32_0 = arith.constant 0 : i32
    %c0_i32_1 = arith.constant 0 : i32
    return %0, %c0_i32, %c0_i32_0 : i32, i32, i32
  }
  func.func @transform_6(%arg0: i32, %arg1: i32, %arg2: memref<1xi32, #tpu.memory_space<smem>>) -> (i32, i32, i32) {
    %c0 = arith.constant 0 : index
    %0 = memref.load %arg2[%c0] : memref<1xi32, #tpu.memory_space<smem>>
    %c0_i32 = arith.constant 0 : i32
    %c0_i32_0 = arith.constant 0 : i32
    %c0_i32_1 = arith.constant 0 : i32
    return %0, %c0_i32, %c0_i32_0 : i32, i32, i32
  }
  func.func @transform_7(%arg0: i32, %arg1: i32, %arg2: memref<1xi32, #tpu.memory_space<smem>>) -> (i32, i32, i32) {
    %c0 = arith.constant 0 : index
    %0 = memref.load %arg2[%c0] : memref<1xi32, #tpu.memory_space<smem>>
    %c0_i32 = arith.constant 0 : i32
    %c0_i32_0 = arith.constant 0 : i32
    %c0_i32_1 = arith.constant 0 : i32
    return %0, %c0_i32, %c0_i32_0 : i32, i32, i32
  }
  func.func @transform_8(%arg0: i32, %arg1: i32, %arg2: memref<1xi32, #tpu.memory_space<smem>>) -> (i32, i32, i32) {
    %c0 = arith.constant 0 : index
    %0 = memref.load %arg2[%c0] : memref<1xi32, #tpu.memory_space<smem>>
    %c0_i32 = arith.constant 0 : i32
    %c0_i32_0 = arith.constant 0 : i32
    %c0_i32_1 = arith.constant 0 : i32
    return %0, %c0_i32, %c0_i32_0 : i32, i32, i32
  }
  func.func @transform_9(%arg0: i32, %arg1: i32, %arg2: memref<1xi32, #tpu.memory_space<smem>>) -> (i32, i32) {
    %c0_i32 = arith.constant 0 : i32
    %c0_i32_0 = arith.constant 0 : i32
    return %arg0, %c0_i32 : i32, i32
  }
}

</mosaic_0001>

<bundles_post_ra>
// kernel: ease_forward.1
= control target key start
LH: loop header
LB: loop body
LE: loop exit
PB: predicated region body
PF: predicated region fallthrough
CT: control target
= control target key end

     0   :  { %s2378_s0 = inlined_call_operand.<no memory space> [shape: s32[1], index: 0, kind: input, shape index: {}]   ;;  %s2379_s1 = inlined_call_operand.vmem [shape: bf16[16,1024], index: 1, kind: input, shape index: {}]   ;;  %s2380_s2 = inlined_call_operand.hbm [shape: bf16[1024,128], index: 2, kind: input, shape index: {}]   ;;  %s2381_s3 = inlined_call_operand.vmem [shape: f32[1,128], index: 3, kind: input, shape index: {}]   ;;  %s2382_s4 = inlined_call_operand.vmem [shape: bf16[2,128,128], index: 4, kind: input, shape index: {}]   ;;  %s2383_s5 = inlined_call_operand.vmem [shape: f32[2,1,128], index: 5, kind: input, shape index: {}]   ;;  %s2384_s6 = inlined_call_operand.vmem [shape: bf16[2,128,128], index: 6, kind: input, shape index: {}]   ;;  %s2385_s7 = inlined_call_operand.vmem [shape: f32[2,1,128], index: 7, kind: input, shape index: {}]   ;;  %s2386_s8 = inlined_call_operand.hbm [shape: bf16[2,128,128], index: 8, kind: input, shape index: {}]   ;;  %s2387_s9 = inlined_call_operand.vmem [shape: f32[2,1,128], index: 9, kind: input, shape index: {}]   ;;  %s2388_s10 = inlined_call_operand.vmem [shape: f32[16,128], index: 10, kind: output, shape index: {}]  }
   0x1   :  { %2396 = sst [smem:[#allocation15_spill]] %s2379_s1 }
   0x2   :  { %2397 = sst [smem:[#allocation16_spill]] %s2380_s2 }
   0x3   :  { %2398 = sst [smem:[#allocation17_spill]] %s2386_s8 }
   0x4   :  { %15 = sst [smem:[#allocation4]] %s2378_s0 }
   0x5   :  { %16 = vsyncpa [#allocation7], 0 }
   0x6   :  { %18 = vsyncpa [#allocation7 + $0x1], 0 }
   0x7   :  { %19 = vsyncpa [#allocation9], 0  ;;  %s2050_s15 = smov 0   ;;  %s2052_s16 = smov 0  }
   0x8   :  { %s2054_s17 = smov 0   ;;  %s2056_s18 = smov 0  }
   0x9   :  { %s2058_s19 = smov 0   ;;  %s2060_s20 = smov 0  }
   0xa   :  { %s2062_s21 = smov 0   ;;  %s2064_s22 = smov 0  }
   0xb LB: > { %2399 = sst [smem:[#allocation12_spill]] %s1977_s21  ;;  %s1475_s0 = sadd.s32 4294967295, %s1981_s22   ;;  %s1981_s22 = sphi %s2064_s22, %s25_s22   ;;  %s1977_s21 = sphi %s2062_s21, %s2417_s21   ;;  %s1973_s20 = sphi %s2060_s20, %s2416_s20   ;;  %s1969_s19 = sphi %s2058_s19, %s2421_s19   ;;  %s1965_s18 = sphi %s2056_s18, %s2420_s18   ;;  %s1961_s17 = sphi %s2054_s17, %s2419_s17   ;;  %s1957_s16 = sphi %s2052_s16, %s2359_s16   ;;  %s1953_s15 = sphi %s2050_s15, %s2418_s15  }
   0xc   : > { %s34_s23 = sadd.s32 1, %s1977_s21  ;;  %s46_s24 = sadd.s32 1, %s1969_s19 }
   0xd   : > { %p35_p0 = scmp.ge.s32.totalorder %s34_s23, 2  ;;  %p53_p1 = scmp.ne.s32.totalorder %s1969_s19, %s1965_s18 }
   0xe   : > { %p54_p2 = scmp.eq.s32.totalorder %s1981_s22, 0  ;;  %p85_p4 = scmp.ne.s32.totalorder %s1965_s18, %s1961_s17 }
   0xf   : > { %s2423_s23 = smov (%p35_p0, %s34_s23), 0  ;;  %p86_p5 = scmp.eq.s32.totalorder %s1475_s0, 0 }
  0x10   : > { %2400 = sst [smem:[#allocation13_spill]] %s2423_s23  ;;  %p2094_p3 = por %p54_p2, %p53_p1 }
  0x11   : > { %s42_s26 = ssub.s32 %s1977_s21, %s2423_s23  ;;  %s228_s27 = sld [smem:[#allocation4]] }
  0x12   : > { %s2401_s25 = scalar_select %p2094_p3, 1, 0 }
  0x13   : > { %p44_p6 = scmp.eq.s32.totalorder %s42_s26, 0  ;;  %p2101_p7 = por %p86_p5, %p85_p4 }
  0x14   : > { %p246_p8 = scmp.ne.s32.totalorder %s1957_s16, %s1953_s15  ;;  %p1476_p9 = scmp.ge.s32.totalorder %s1981_s22, 1 }
  0x15   : > { %s2402_s28 = scalar_select %p2101_p7, 1, 0 }
  0x16   : > { %s2106_s29 = scalar_select %p44_p6, %s1969_s19, %s46_s24  }
  0x17   : > { %p311_p10 = scmp.lt.s32.totalorder %s1981_s22, 3  ;;  %p2111_p11 = por %p246_p8, %p86_p5 }
  0x18   : > { %2403 = sst [smem:[#allocation14_spill]] %s2106_s29  ;;  %s1983_s11 = smov [#allocation8]  }
  0x19   : > { %s2404_s30 = scalar_select %p2111_p11, 1, 0 }
  0x1a   : > { %s366_s12 = sshll.u32 %s1983_s11, 4  ;;  %p2115_p12 = pnand %p1476_p9, %p311_p10  ;;  %s2126_s12 = int_to_ptr.vmem [resolvable:$true] %s366_s12 }
  0x1b   : > { %s1563_s14 = sshll.u32 %s228_s27, 10  ;;  %s2406_s8 = sld [smem:[#allocation17_spill]] }
  0x1c   : > { %s2405_s13 = scalar_select %p2115_p12, 1, 0 }
  0x1d   : > { %p1703_p13 = pneg %p2115_p12 }
  0x1f   : > { %p2130_p0 = pnand %p1703_p13, %p2111_p11 }
  0x21   : > { %s2124_s15 = scalar_lea.hbm %s2406_s8, %s1563_s14  ;;  %p1851_p2 = pneg %p2130_p0 }
  0x22   : > { %s1849_s26 = scalar_lea.hbm %s2124_s15, 1024  ;;  %s1854_s14 = scalar_lea.hbm %s2406_s8, 2048 }
  0x23   : > { %p1850_p1 = scmp.ne.s32.totalorder %s2124_s15, %s1849_s26  ;;  %p1855_p6 = scmp.lt.u32.totalorder %s2124_s15, %s2406_s8 }
  0x24   : > { %p1856_p8 = scmp.lt.u32.totalorder %s1854_s14, %s1849_s26  ;;  %p1858_p10 = scmp.lt.u32.totalorder %s1849_s26, %s2124_s15 }
  0x25   : > { %p1852_p4 = pnand %p1851_p2, %p1850_p1 }
  0x26   : > { %p1857_p9 = por %p1856_p8, %p1855_p6 }
  0x27   : > { %p1853_p5 = pneg %p1852_p4 }
  0x28   : > { %p1859_p13 = por %p1858_p10, %p1857_p9 }
  0x2a   : > { %p1860_p11 = pnand %p1859_p13, %p1853_p5 }
  0x2c   : > { %1863 = shalt.err (!%p1860_p11)
}
  0x2d   : > { %s1864_s23 = scalar_lea.vmem %s2126_s12, 1024  ;;  %p1872_p12 = scmp.lt.s32.totalorder %s2126_s12, %s2126_s12 }
  0x2e   : > { %p1865_p1 = scmp.ne.s32.totalorder %s2126_s12, %s1864_s23  ;;  %p1873_p3 = scmp.lt.s32.totalorder %s1864_s23, %s1864_s23 }
  0x30   : > { %p1867_p4 = pnand %p1865_p1, %p1851_p2  ;;  %p1874_p6 = por %p1873_p3, %p1872_p12 }
  0x32   : > { %p1868_p7 = pneg %p1867_p4 }
  0x34   : > { %p1875_p8 = pnand %p1874_p6, %p1868_p7 }
  0x36   : > { %1878 = shalt.err (!%p1875_p8)
}
  0x37   : > { %s1984_s26 = smov 64   ;;  %s1985_s27 = smov 4  }
  0x38   : > { %1706 = dma.hbm_to_vmem [thread:$0]  (!%p2130_p0), %s2124_s15, 1024, %s2126_s12, [#allocation9], %s1984_s26, %s1984_s26, %s1985_s27  }
  0x39   : > { %p1479_p11 = scmp.ge.s32.totalorder %s1981_s22, 2 }
  0x3a   : > { %p2408_p5 = scmp.ne.s32.totalorder (!%p1479_p11), %s2401_s25, 0 }
  0x3b   : > { %384 = sbr.rel (%p1479_p11) target bundleno = 108 (0x6c), region = 44 }
  0x42   : > { %387 = sbr.rel (!%p2408_p5) target bundleno = 78 (0x4e), region = 48  ;;  %s389_s11 = sand.u32 (%p2408_p5), 1, %s1969_s19  }
  0x43   : > { %s1564_s23 = sshll.u32 (%p2408_p5), %s1977_s21, 4  ;;  %s1480_s14 = sshll.u32 (%p2408_p5), %s389_s11, 5 }
  0x44   : > { %s2409_s1 = sld [smem:[#allocation15_spill]] (%p2408_p5)  ;;  %s391_s24 = scalar_lea.vmem (%p2408_p5), [#allocation5], %s1480_s14 }
  0x4a   : > { %s397_s8 = scalar_lea.vmem %s2409_s1, %s1564_s23 }
  0x4b   : > { %v410_v0 = vld [vmem:[%s397_s8] sm:$0xff]  ;;  %v412_v1 = vld [vmem:[%s397_s8 + $0x8] sm:$0xff] }
  0x4c   : > { %v414_v2 = vld [vmem:[%s397_s8 + $0x20] sm:$0xff]  ;;  %411 = vst [vmem:[%s391_s24] sm:$0xff] %v410_v0  ;;  %413 = vst [vmem:[%s391_s24 + $0x8] sm:$0xff] %v412_v1  ;;  %v416_v3 = vld [vmem:[%s397_s8 + $0x28] sm:$0xff] }
  0x4d   : > { %415 = vst [vmem:[%s391_s24 + $0x10] sm:$0xff] %v414_v2  ;;  %417 = vst [vmem:[%s391_s24 + $0x18] sm:$0xff] %v416_v3 }
  0x4e PF: > { %s424_s12 = sand.u32 1, %s1969_s19   ;;  %s1565_s15 = sshll.u32 %s1977_s21, 12 }
  0x4f   : > { %s1483_s26 = sshll.u32 %s424_s12, 8  ;;  %s2410_s2 = sld [smem:[#allocation16_spill]] }
  0x50   : > { %s428_s14 = scalar_lea.vmem [#allocation6], %s1483_s26  ;;  %s2177_s8 = scalar_lea.sflag [#allocation7], %s424_s12 }
  0x51   : > { %s435_s17 = sshll.u32 %s428_s14, 4  ;;  %p2411_p7 = scmp.ne.s32.totalorder %s2401_s25, 0  ;;  %s2175_s17 = int_to_ptr.vmem [resolvable:$true] %s435_s17 }
  0x55   : > { %s2173_s23 = scalar_lea.hbm %s2410_s2, %s1565_s15  ;;  %s1883_s15 = scalar_lea.hbm %s2410_s2, 8192 }
  0x56   : > { %s1879_s0 = scalar_lea.hbm %s2173_s23, 4096  ;;  %p1884_p2 = scmp.lt.u32.totalorder %s2173_s23, %s2410_s2 }
  0x57   : > { %p1880_p3 = scmp.ne.s32.totalorder %s2173_s23, %s1879_s0  ;;  %p1885_p9 = scmp.lt.u32.totalorder %s1883_s15, %s1879_s0 }
  0x58   : > { %p1887_p13 = scmp.lt.u32.totalorder %s1879_s0, %s2173_s23 }
  0x59   : > { %p1881_p12 = pnand %p1880_p3, %p2411_p7  ;;  %p1886_p10 = por %p1885_p9, %p1884_p2 }
  0x5b   : > { %p1882_p0 = pneg %p1881_p12  ;;  %p1888_p1 = por %p1887_p13, %p1886_p10 }
  0x5d   : > { %p1889_p4 = pnand %p1888_p1, %p1882_p0 }
  0x5f   : > { %1892 = shalt.err (!%p1889_p4)
}
  0x60   : > { %s1893_s12 = scalar_lea.vmem %s2175_s17, 4096  ;;  %s1986_s1 = smov [#allocation6]  }
  0x61   : > { %p1894_p6 = scmp.ne.s32.totalorder %s2175_s17, %s1893_s12  ;;  %s1897_s26 = sshll.u32 %s1986_s1, 4  ;;  %s1898_s26 = int_to_ptr.vmem [resolvable:$false] %s1897_s26 }
  0x62   : > { %s1899_s14 = scalar_lea.vmem %s1898_s26, 8192  ;;  %p1900_p5 = scmp.lt.s32.totalorder %s2175_s17, %s1898_s26 }
  0x63   : > { %p1895_p8 = pnand %p1894_p6, %p2411_p7  ;;  %p1901_p3 = scmp.lt.s32.totalorder %s1899_s14, %s1893_s12 }
  0x65   : > { %p1896_p11 = pneg %p1895_p8  ;;  %p1902_p12 = por %p1901_p3, %p1900_p5 }
  0x67   : > { %p1903_p2 = pnand %p1902_p12, %p1896_p11 }
  0x69   : > { %1906 = shalt.err (!%p1903_p2)
}
  0x6a   : > { %s1987_s0 = smov 64   ;;  %s1988_s24 = smov 4  }
  0x6b   : > { %1700 = dma.hbm_to_vmem [thread:$0]  (%p2411_p7), %s2173_s23, 4096, %s2175_s17, %s2177_s8, %s1987_s0, %s1987_s0, %s1988_s24  }
  0x6c PF: > { %p2412_p0 = scmp.ne.s32.totalorder %s2405_s13, 0 }
  0x6d   : > { %s450_s15 = sand.u32 (!%p2412_p0), 1, %s1965_s18   ;;  %p2413_p9 = scmp.ne.s32.totalorder (!%p2412_p0), %s2402_s28, 0 }
  0x6e   : > { %447 = sbr.rel (%p2412_p0) target bundleno = 1060 (0x424), region = 75  ;;  %s1487_s27 = sshll.u32 (!%p2412_p0), %s450_s15, 5 }
  0x6f   : > { %s1488_s11 = sshll.u32 (!%p2412_p0), %s450_s15, 8  ;;  %s2204_s12 = scalar_lea.vmem (!%p2412_p0), [#allocation5], %s1487_s27 }
  0x70   : > { %s457_s1 = scalar_lea.sflag (!%p2412_p0), [#allocation7], %s450_s15  ;;  %s2206_s26 = scalar_lea.vmem (!%p2412_p0), [#allocation6], %s1488_s11 }
  0x75   : > { %1944 = dma.done.wait (%p2413_p9), %s457_s1, 4096  }
  0x76   : > { %1946 = vsyncadd (%p2413_p9), %s457_s1, 4294963200  ;;  %p2414_p7 = scmp.ne.s32.totalorder %s2404_s30, 0 }
  0x78   : > { %1948 = dma.done.wait (%p2414_p7), [#allocation9], 1024  }
  0x79   : > { %1950 = vsyncadd (%p2414_p7), [#allocation9], 4294966272  ;;  %s530_s25 = sld [smem:[#allocation4]]  ;;  %p1493_p13 = scmp.ne.s32.totalorder %s1973_s20, 0 }
  0x7a   : > { %v1989_v4 = vmov (!%p1493_p13), 0.0  }
  0x7b   : > { %571 = vst [vmem:[#allocation2] sm:$0xff] (!%p1493_p13), %v1989_v4  ;;  %572 = vst [vmem:[#allocation2 + $0x8] sm:$0xff] (!%p1493_p13), %v1989_v4 }
  0x7e   : > { %570 = sbr.rel (%p1493_p13) target bundleno = 133 (0x85), region = 91 }
  0x7f   : > { %p531_p10 = scmp.lt.s32.totalorder %s530_s25, 1 }
  0x81   : > { %s2425_s25 = smov (!%p531_p10, %s530_s25), 1 }
  0x82   : > { %s1566_s13 = sshll.u32 %s2425_s25, 6  ;;  %s540_s28 = scalar_lea.vmem %s2383_s5, %s2425_s25 }
  0x83   : > { %s2226_s0 = scalar_lea.vmem %s2382_s4, %s1566_s13  ;;  %s2231_s15 = scalar_lea.vmem %s2384_s6, %s1566_s13 }
  0x84   : > { %s552_s1 = scalar_lea.vmem %s2385_s7, %s2425_s25  ;;  %s558_s29 = scalar_lea.vmem %s2387_s9, %s2425_s25 }
  0x85 PF: > { %v1787_v5 = vld [vmem:[%s2206_s26 + $0x40] sm:$0xff]   ;;  %v1791_v9 = vld [vmem:[%s2206_s26 + $0x48] sm:$0xff]   ;;  %v1795_v13 = vld [vmem:[%s2206_s26 + $0x50] sm:$0xff]   ;;  %p1530_p1 = scmp.ne.s32.totalorder %s1973_s20, 1 }
  0x86   : > { %v1788_v6 = vld [vmem:[%s2206_s26 + $0xc0] sm:$0xff]   ;;  %1568 = vmatprep.subr.bf16.mxu0 %v1787_v5  ;;  %v1792_v10 = vld [vmem:[%s2206_s26 + $0xc8] sm:$0xff]   ;;  %v1796_v14 = vld [vmem:[%s2206_s26 + $0xd0] sm:$0xff]   ;;  %v1990_v60 = vmov (!%p1530_p1), 0.0   ;;  %vm1991_vm0 = vmmov (!%p1530_p1), 0  }
  0x87   : > { %v1789_v7 = vld [vmem:[%s2206_s26] sm:$0xff]   ;;  %1590 = vmatprep.subr.bf16.mxu1 %v1788_v6  ;;  %v1793_v11 = vld [vmem:[%s2206_s26 + $0x8] sm:$0xff]   ;;  %v1797_v15 = vld [vmem:[%s2206_s26 + $0x10] sm:$0xff]  }
  0x88   : > { %v1790_v8 = vld [vmem:[%s2206_s26 + $0x80] sm:$0xff]   ;;  %1569 = vmatpush3.bf16.msra.mxu0 %v1789_v7  ;;  %v1794_v12 = vld [vmem:[%s2206_s26 + $0x88] sm:$0xff]   ;;  %v1798_v16 = vld [vmem:[%s2206_s26 + $0x90] sm:$0xff]  }
  0x89   : > { %1591 = vmatpush3.bf16.msra.mxu1 %v1790_v8  ;;  %1570 = vmatprep.subr.bf16.mxu0 %v1791_v9  ;;  %v1799_v17 = vld [vmem:[%s2206_s26 + $0x58] sm:$0xff]   ;;  %v1803_v21 = vld [vmem:[%s2206_s26 + $0x60] sm:$0xff]   ;;  %v1807_v25 = vld [vmem:[%s2206_s26 + $0x68] sm:$0xff]  }
  0x8a   : > { %1592 = vmatprep.subr.bf16.mxu1 %v1792_v10  ;;  %v1800_v18 = vld [vmem:[%s2206_s26 + $0xd8] sm:$0xff]   ;;  %v1804_v22 = vld [vmem:[%s2206_s26 + $0xe0] sm:$0xff]   ;;  %v1808_v26 = vld [vmem:[%s2206_s26 + $0xe8] sm:$0xff]  }
  0x8b   : > { %v1801_v19 = vld [vmem:[%s2206_s26 + $0x18] sm:$0xff]   ;;  %v1805_v23 = vld [vmem:[%s2206_s26 + $0x20] sm:$0xff]   ;;  %v1809_v27 = vld [vmem:[%s2206_s26 + $0x28] sm:$0xff]  }
  0x8c   : > { %1571 = vmatpush3.bf16.msra.mxu0 %v1793_v11  ;;  %v1802_v20 = vld [vmem:[%s2206_s26 + $0x98] sm:$0xff]   ;;  %v1806_v24 = vld [vmem:[%s2206_s26 + $0xa0] sm:$0xff]   ;;  %v1810_v28 = vld [vmem:[%s2206_s26 + $0xa8] sm:$0xff]  }
  0x8d   : > { %1593 = vmatpush3.bf16.msra.mxu1 %v1794_v12  ;;  %1572 = vmatprep.subr.bf16.mxu0 %v1795_v13  ;;  %v1811_v29 = vld [vmem:[%s2206_s26 + $0x70] sm:$0xff]   ;;  %v1815_v33 = vld [vmem:[%s2206_s26 + $0x78] sm:$0xff]   ;;  %v1827_v62 = vld [vmem:[%s2226_s0 + $0x10] sm:$0xff] (!%p1530_p1)  }
  0x8e   : > { %1594 = vmatprep.subr.bf16.mxu1 %v1796_v14  ;;  %v1812_v30 = vld [vmem:[%s2206_s26 + $0xf0] sm:$0xff]   ;;  %v1816_v34 = vld [vmem:[%s2206_s26 + $0xf8] sm:$0xff]   ;;  %v1828_v0 = vld [vmem:[%s2226_s0 + $0x18] sm:$0xff] (!%p1530_p1)  }
  0x8f   : > { %v1813_v31 = vld [vmem:[%s2206_s26 + $0x30] sm:$0xff]   ;;  %v1817_v35 = vld [vmem:[%s2206_s26 + $0x38] sm:$0xff]   ;;  %v1835_v3 = vld [vmem:[%s2231_s15 + $0x10] sm:$0xff] (!%p1530_p1)  }
  0x90   : > { %1573 = vmatpush3.bf16.msra.mxu0 %v1797_v15  ;;  %v1814_v32 = vld [vmem:[%s2206_s26 + $0xb0] sm:$0xff]   ;;  %v1818_v36 = vld [vmem:[%s2206_s26 + $0xb8] sm:$0xff]   ;;  %v1836_v8 = vld [vmem:[%s2231_s15 + $0x18] sm:$0xff] (!%p1530_p1)  }
  0x91   : > { %1595 = vmatpush3.bf16.msra.mxu1 %v1798_v16  ;;  %1574 = vmatprep.subr.bf16.mxu0 %v1799_v17  ;;  %v1819_v37 = vld [vmem:[%s2204_s12] ss:$16 sps:$4 sm:$0xff]   ;;  %v1821_v38 = vld [vmem:[%s2204_s12 + $0x4] ss:$16 sps:$4 sm:$0xff]   ;;  %v1822_v39 = vld [vmem:[%s2204_s12 + $0x8] ss:$16 sps:$4 sm:$0xff]  }
  0x92   : > { %1596 = vmatprep.subr.bf16.mxu1 %v1800_v18  ;;  %v1824_v40 = vld [vmem:[%s2204_s12 + $0xc] ss:$16 sps:$4 sm:$0xff]   ;;  %887 = vmatprep.mubr.bf16.mxu0 %v1821_v38  ;;  %v573_v50 = vld [vmem:[#allocation2] sm:$0xff]  ;;  %v1831_v11 = vld [vmem:[%s2226_s0 + $0x30] sm:$0xff] (!%p1530_p1)  }
  0x93   : > { %928 = vmatprep.mubr.bf16.mxu1 %v1824_v40  ;;  %v574_v55 = vld [vmem:[#allocation2 + $0x8] sm:$0xff]  ;;  %v1825_v59 = vld [vmem:[%s2226_s0] sm:$0xff] (!%p1530_p1)   ;;  %v1832_v15 = vld [vmem:[%s2226_s0 + $0x38] sm:$0xff] (!%p1530_p1)  }
  0x94   : > { %1575 = vmatpush3.bf16.msra.mxu0 %v1801_v19  ;;  %v1826_v61 = vld [vmem:[%s2226_s0 + $0x8] sm:$0xff] (!%p1530_p1)   ;;  %v1833_v63 = vld [vmem:[%s2231_s15] sm:$0xff] (!%p1530_p1)   ;;  %v1839_v18 = vld [vmem:[%s2231_s15 + $0x30] sm:$0xff] (!%p1530_p1)  }
  0x95   : > { %1597 = vmatpush3.bf16.msra.mxu1 %v1802_v20  ;;  %1576 = vmatprep.subr.bf16.mxu0 %v1803_v21  ;;  %v1834_v1 = vld [vmem:[%s2231_s15 + $0x8] sm:$0xff] (!%p1530_p1)   ;;  %v1829_v2 = vld [vmem:[%s2226_s0 + $0x20] sm:$0xff] (!%p1530_p1)   ;;  %v1840_v19 = vld [vmem:[%s2231_s15 + $0x38] sm:$0xff] (!%p1530_p1)  }
  0x96   : > { %1598 = vmatprep.subr.bf16.mxu1 %v1804_v22  ;;  %v1830_v4 = vld [vmem:[%s2226_s0 + $0x28] sm:$0xff] (!%p1530_p1)   ;;  %v1531_v7 = vld [vmem:[%s2381_s3] ss:$0 sm:$0xff] (!%p1530_p1)  ;;  %v1841_v20 = vld [vmem:[#allocation8] sm:$0xff] (!%p1530_p1)  }
  0x97   : > { %v1837_v12 = vld [vmem:[%s2231_s15 + $0x20] sm:$0xff] (!%p1530_p1)   ;;  %v1838_v16 = vld [vmem:[%s2231_s15 + $0x28] sm:$0xff] (!%p1530_p1)   ;;  %v1842_v21 = vld [vmem:[#allocation8 + $0x8] sm:$0xff] (!%p1530_p1)  }
  0x98   : > { %1577 = vmatpush3.bf16.msra.mxu0 %v1805_v23  ;;  %v1843_v22 = vld [vmem:[#allocation8 + $0x10] sm:$0xff] (!%p1530_p1)   ;;  %v1844_v23 = vld [vmem:[#allocation8 + $0x18] sm:$0xff] (!%p1530_p1)  }
  0x99   : > { %1599 = vmatpush3.bf16.msra.mxu1 %v1806_v24  ;;  %1578 = vmatprep.subr.bf16.mxu0 %v1807_v25  ;;  %v1845_v24 = vld [vmem:[#allocation8 + $0x20] sm:$0xff] (!%p1530_p1)   ;;  %v1846_v25 = vld [vmem:[#allocation8 + $0x28] sm:$0xff] (!%p1530_p1)   ;;  %v1541_v38 = vld [vmem:[%s552_s1] ss:$0 sm:$0xff] (!%p1530_p1) }
  0x9a   : > { %1600 = vmatprep.subr.bf16.mxu1 %v1808_v26  ;;  %v1532_v26 = vld [vmem:[%s540_s28] ss:$0 sm:$0xff] (!%p1530_p1) }
  0x9c   : > { %1579 = vmatpush3.bf16.msra.mxu0 %v1809_v27 }
  0x9d   : > { %1601 = vmatpush3.bf16.msra.mxu1 %v1810_v28  ;;  %1580 = vmatprep.subr.bf16.mxu0 %v1811_v29 }
  0x9e   : > { %1602 = vmatprep.subr.bf16.mxu1 %v1812_v30 }
  0xa0   : > { %1581 = vmatpush3.bf16.msra.mxu0 %v1813_v31 }
  0xa1   : > { %1603 = vmatpush3.bf16.msra.mxu1 %v1814_v32  ;;  %1582 = vmatprep.subr.bf16.mxu0 %v1815_v33 }
  0xa2   : > { %1604 = vmatprep.subr.bf16.mxu1 %v1816_v34 }
  0xa4   : > { %1583 = vmatpush3.bf16.msra.mxu0 %v1817_v35 }
  0xa5   : > { %1605 = vmatpush3.bf16.msra.mxu1 %v1818_v36  ;;  %1639 = vmatprep.subr.bf16.mxu0 (!%p1530_p1), %v1990_v60  ;;  %v1847_v36 = vld [vmem:[#allocation8 + $0x30] sm:$0xff] (!%p1530_p1)  }
  0xa6   : > { %1659 = vmatprep.subr.bf16.mxu1 (!%p1530_p1), %v1990_v60 }
  0xa7   : > { %888 = vmatmul.mubr.bf16.vlgmr.msra.gmra.mrb[0].mxu0 %v1819_v37  ;;  %v1848_v37 = vld [vmem:[#allocation8 + $0x38] sm:$0xff] (!%p1530_p1)  }
  0xa8   : > { %929 = vmatmul.mubr.bf16.vlgmr.msra.gmra.mrb[0].mxu1 %v1822_v39  ;;  %1640 = vmatpush3.bf16.msra.mxu0 (!%p1530_p1), %v1825_v59 }
  0xa9   : > { %1655 = vmatprep.mubr.msk.bf16.mxu0 (!%p1530_p1), %vm1991_vm0, %v1990_v60  ;;  %1641 = vmatprep.subr.bf16.mxu0 (!%p1530_p1), %v1990_v60 }
  0xaa   : > { %1675 = vmatprep.mubr.msk.bf16.mxu1 (!%p1530_p1), %vm1991_vm0, %v1990_v60  ;;  %1660 = vmatpush3.bf16.msra.mxu1 (!%p1530_p1), %v1833_v63 }
  0xab   : > { %1661 = vmatprep.subr.bf16.mxu1 (!%p1530_p1), %v1990_v60 }
  0xac   : > { %1642 = vmatpush3.bf16.msra.mxu0 (!%p1530_p1), %v1826_v61 }
  0xad   : > { %1643 = vmatprep.subr.bf16.mxu0 (!%p1530_p1), %v1990_v60 }
  0xae   : > { %1662 = vmatpush3.bf16.msra.mxu1 (!%p1530_p1), %v1834_v1 }
  0xaf   : > { %1663 = vmatprep.subr.bf16.mxu1 (!%p1530_p1), %v1990_v60 }
  0xb0   : > { %1644 = vmatpush3.bf16.msra.mxu0 (!%p1530_p1), %v1827_v62 }
  0xb1   : > { %1645 = vmatprep.subr.bf16.mxu0 (!%p1530_p1), %v1990_v60 }
  0xb2   : > { %1664 = vmatpush3.bf16.msra.mxu1 (!%p1530_p1), %v1835_v3 }
  0xb3   : > { %1665 = vmatprep.subr.bf16.mxu1 (!%p1530_p1), %v1990_v60 }
  0xb4   : > { %1646 = vmatpush3.bf16.msra.mxu0 (!%p1530_p1), %v1828_v0 }
  0xb5   : > { %1647 = vmatprep.subr.bf16.mxu0 (!%p1530_p1), %v1990_v60 }
  0xb6   : > { %1666 = vmatpush3.bf16.msra.mxu1 (!%p1530_p1), %v1836_v8 }
  0xb7   : > { %1667 = vmatprep.subr.bf16.mxu1 (!%p1530_p1), %v1990_v60 }
  0xb8   : > { %1648 = vmatpush3.bf16.msra.mxu0 (!%p1530_p1), %v1829_v2 }
  0xb9   : > { %1649 = vmatprep.subr.bf16.mxu0 (!%p1530_p1), %v1990_v60 }
  0xba   : > { %1668 = vmatpush3.bf16.msra.mxu1 (!%p1530_p1), %v1837_v12 }
  0xbb   : > { %1669 = vmatprep.subr.bf16.mxu1 (!%p1530_p1), %v1990_v60 }
  0xbc   : > { %1650 = vmatpush3.bf16.msra.mxu0 (!%p1530_p1), %v1830_v4 }
  0xbd   : > { %1651 = vmatprep.subr.bf16.mxu0 (!%p1530_p1), %v1990_v60 }
  0xbe   : > { %1670 = vmatpush3.bf16.msra.mxu1 (!%p1530_p1), %v1838_v16 }
  0xbf   : > { %1671 = vmatprep.subr.bf16.mxu1 (!%p1530_p1), %v1990_v60 }
  0xc0   : > { %1652 = vmatpush3.bf16.msra.mxu0 (!%p1530_p1), %v1831_v11 }
  0xc1   : > { %1653 = vmatprep.subr.bf16.mxu0 (!%p1530_p1), %v1990_v60 }
  0xc2   : > { %1672 = vmatpush3.bf16.msra.mxu1 (!%p1530_p1), %v1839_v18 }
  0xc3   : > { %1673 = vmatprep.subr.bf16.mxu1 (!%p1530_p1), %v1990_v60 }
  0xc4   : > { %1654 = vmatpush3.bf16.msra.mxu0 (!%p1530_p1), %v1832_v15 }
  0xc5   : > { %1679 = vmatprep.subr.bf16.mxu0 (!%p1530_p1), %v1990_v60 }
  0xc6   : > { %1674 = vmatpush3.bf16.msra.mxu1 (!%p1530_p1), %v1840_v19 }
 0x17a   : > { %v1584_v41 = vpop.f32.mrb[0].mxu0 }
 0x17b   : > { %v1606_v42 = vpop.f32.mrb[0].mxu1  ;;  %v1585_v43 = vpop.f32.mrb[1].mxu0 }
 0x17c   : > { %v1586_v44 = vadd.f32 %v1585_v43, %v1584_v41  ;;  %v1607_v45 = vpop.f32.mrb[1].mxu1  ;;  %v1587_v46 = vpop.f32.mrb[2].mxu0 }
 0x17d   : > { %v1608_v47 = vadd.f32 %v1607_v45, %v1606_v42  ;;  %v1609_v48 = vpop.f32.mrb[2].mxu1  ;;  %v1588_v49 = vpop.f32.mrb[3].mxu0 }
 0x17e   : > { %v1589_v51 = vadd.f32 %v1588_v49, %v1587_v46  ;;  %v1610_v52 = vpop.f32.mrb[3].mxu1 }
 0x17f   : > { %v931_v53 = vadd.f32 %v1608_v47, %v1586_v44  ;;  %v1611_v54 = vadd.f32 %v1610_v52, %v1609_v48  ;;  %944 = sbr.rel (%p1530_p1) target bundleno = 1060 (0x424), region = 95  ;;  %v1550_v48 = vld [vmem:[%s558_s29] ss:$0 sm:$0xff] (!%p1530_p1) }
 0x181   : > { %v937_v56 = vadd.f32 %v931_v53, %v573_v50  ;;  %v934_v57 = vadd.f32 %v1611_v54, %v1589_v51 }
 0x183   : > { %939 = vst [vmem:[#allocation2] sm:$0xff] %v937_v56  ;;  %v938_v58 = vadd.f32 %v934_v57, %v574_v55 }
 0x185   : > { %940 = vst [vmem:[#allocation2 + $0x8] sm:$0xff] %v938_v58 }
 0x18a   : > { %v945_v5 = vld [vmem:[#allocation2] sm:$0xff] }
 0x18b   : > { %v2306_v9 = vadd.f32 %v1531_v7, %v945_v5 }
 0x18c   : > { %v946_v6 = vld [vmem:[#allocation2 + $0x8] sm:$0xff] }
 0x18d   : > { %v2308_v10 = vadd.f32 %v1531_v7, %v946_v6  ;;  %v956_v13 = vmax.f32 %v2306_v9, 0.0 }
 0x18f   : > { %v957_v14 = vmax.f32 %v2308_v10, 0.0 }
 0x191   : > { %v958_v17 = vpack.c.bf16 %v957_v14, %v956_v13 }
 0x193   : > { %1656 = vmatmul.mubr.bf16.vlgmr.msra.gmra.mrb[0].mxu0 %v958_v17 }
 0x194   : > { %1695 = vmatprep.mubr.msk.bf16.mxu0 %vm1991_vm0, %v1990_v60  ;;  %1680 = vmatpush3.bf16.msra.mxu0 %v1841_v20 }
 0x195   : > { %1681 = vmatprep.subr.bf16.mxu0 %v1990_v60 }
 0x198   : > { %1682 = vmatpush3.bf16.msra.mxu0 %v1842_v21 }
 0x199   : > { %1683 = vmatprep.subr.bf16.mxu0 %v1990_v60 }
 0x19c   : > { %1684 = vmatpush3.bf16.msra.mxu0 %v1843_v22 }
 0x19d   : > { %1685 = vmatprep.subr.bf16.mxu0 %v1990_v60 }
 0x1a0   : > { %1686 = vmatpush3.bf16.msra.mxu0 %v1844_v23 }
 0x1a1   : > { %1687 = vmatprep.subr.bf16.mxu0 %v1990_v60 }
 0x1a4   : > { %1688 = vmatpush3.bf16.msra.mxu0 %v1845_v24 }
 0x1a5   : > { %1689 = vmatprep.subr.bf16.mxu0 %v1990_v60 }
 0x1a8   : > { %1690 = vmatpush3.bf16.msra.mxu0 %v1846_v25 }
 0x1a9   : > { %1691 = vmatprep.subr.bf16.mxu0 %v1990_v60 }
 0x1ac   : > { %1692 = vmatpush3.bf16.msra.mxu0 %v1847_v36 }
 0x1ad   : > { %1693 = vmatprep.subr.bf16.mxu0 %v1990_v60 }
 0x1b0   : > { %1694 = vmatpush3.bf16.msra.mxu0 %v1848_v37 }
 0x266   : > { %v1064_v27 = vpop.f32.mrb[0].mxu0 }
 0x267   : > { %v1065_v28 = vadd.f32 %v1532_v26, %v1064_v27  ;;  %v1657_v29 = vpop.f32.mrb[1].mxu0 }
 0x268   : > { %v1067_v30 = vpop.f32.mrb[2].mxu0 }
 0x269   : > { %v1068_v31 = vadd.f32 %v1532_v26, %v1067_v30  ;;  %v1658_v32 = vpop.f32.mrb[3].mxu0  ;;  %v1071_v33 = vmax.f32 %v1065_v28, 0.0 }
 0x26b   : > { %v1072_v34 = vmax.f32 %v1068_v31, 0.0 }
 0x26d   : > { %v1073_v35 = vpack.c.bf16 %v1072_v34, %v1071_v33 }
 0x26f   : > { %1676 = vmatmul.mubr.bf16.vlgmr.msra.gmra.mrb[0].mxu1 %v1073_v35 }
 0x342   : > { %v1179_v39 = vpop.f32.mrb[0].mxu1 }
 0x343   : > { %v1180_v40 = vadd.f32 %v1541_v38, %v1179_v39  ;;  %v1677_v41 = vpop.f32.mrb[1].mxu1 }
 0x344   : > { %v1182_v42 = vpop.f32.mrb[2].mxu1 }
 0x345   : > { %v1183_v43 = vadd.f32 %v1541_v38, %v1182_v42  ;;  %v1678_v44 = vpop.f32.mrb[3].mxu1  ;;  %v1186_v45 = vadd.f32 %v1180_v40, %v956_v13 }
 0x347   : > { %v1187_v46 = vadd.f32 %v1183_v43, %v957_v14 }
 0x349   : > { %v1188_v47 = vpack.c.bf16 %v1187_v46, %v1186_v45 }
 0x34b   : > { %1696 = vmatmul.mubr.bf16.vlgmr.msra.gmra.mrb[4].mxu0 %v1188_v47 }
 0x41e   : > { %v1294_v49 = vpop.f32.mrb[4].mxu0 }
 0x41f   : > { %v1295_v50 = vadd.f32 %v1550_v48, %v1294_v49  ;;  %v1697_v51 = vpop.f32.mrb[5].mxu0 }
 0x420   : > { %v1297_v52 = vpop.f32.mrb[6].mxu0 }
 0x421   : > { %1301 = vst [vmem:[%s2388_s10] sm:$0xff] %v1295_v50  ;;  %v1298_v53 = vadd.f32 %v1550_v48, %v1297_v52  ;;  %v1698_v54 = vpop.f32.mrb[7].mxu0 }
 0x423   : > { %1302 = vst [vmem:[%s2388_s10 + $0x8] sm:$0xff] %v1298_v53 }
 0x424 PF: > { %s25_s22 = sadd.s32 1, %s1981_s22   ;;  %s2415_s29 = sld [smem:[#allocation14_spill]] }
 0x425   : > { %p22_p4 = scmp.ge.s32.totalorder %s25_s22, 4   ;;  %s2416_s20 = sld [smem:[#allocation12_spill]] }
 0x426   : > { %s2417_s21 = sld [smem:[#allocation13_spill]]  ;;  %s2418_s15 = smov %s1957_s16 }
 0x427   : > { %s2359_s16 = smov 0   ;;  %s2419_s17 = smov %s1965_s18 }
 0x428   : > { %s2420_s18 = smov %s1969_s19  ;;  %24 = sbr.rel (!%p22_p4) target bundleno = 11 (0xb), region = 155 }
 0x42a   : > { %s2421_s19 = smov %s2415_s29 }
 0x42f   :  { %1325 = vsyncpa [#allocation7], 1 }
 0x430   :  { %1327 = vsyncpa [#allocation7 + $0x1], 1 }
 0x431   :  { %1328 = vsyncpa [#allocation9], 1 }

</bundles_post_ra>
